<compile_context>
chip_gen: v6e
topology: v6e:2x2x1
jax: 0.10.0
libtpu: 0.0.40
codegen_flags: <defaults>
</compile_context>

<pallas_src>
import functools
import math

import jax
import jax.numpy as jnp
from jax import lax
from jax.experimental import pallas as pl
from jax.experimental.pallas import tpu as pltpu


# ----------------------------------------------------------------------------
# Fused kernel: all transformer layers for one batch block.
# grid = (num_batch_blocks, num_layers); the output block (the residual
# stream) is resident in VMEM across the inner "arbitrary" layer axis.
# ----------------------------------------------------------------------------
def fused_layers_kernel(
    x0_ref,      # (Bt, P, D) f32  embed + pos for this batch block
    wq_ref,      # (D, H*dh)       folded Q weights (1/sqrt(dh) pre-folded)
    wk_ref,      # (D, H*dh)
    wv_ref,      # (D, H*dh)
    wo_ref,      # (H, dh, D)      per-head output projection (lane-dense D)
    win_ref,     # (D, d_mlp)
    bin_ref,     # (1, d_mlp) f32
    wout_ref,    # (d_mlp, D)
    bout_ref,    # (1, D) f32
    resid_ref,   # (Bt, P, D) f32  OUTPUT = residual stream (resident over l)
    *, num_heads, d_head,
):
    l = pl.program_id(1)

    @pl.when(l == 0)
    def _init():
        resid_ref[...] = x0_ref[...]

    x = resid_ref[...]                              # (Bt, P, D) f32
    Bt, P, D = x.shape
    H, dh = num_heads, d_head
    M = Bt * P
    cdt = wq_ref.dtype                              # MXU input dtype (f32/bf16)

    xf = x.reshape(M, D)                            # f32 residual, flattened
    xc = xf.astype(cdt)

    # ---- lane-dense projections: one 2D matmul each (f32 accumulation) ----
    q = jnp.dot(xc, wq_ref[...], preferred_element_type=jnp.float32)  # (M,H*dh)
    k = jnp.dot(xc, wk_ref[...], preferred_element_type=jnp.float32)
    v = jnp.dot(xc, wv_ref[...], preferred_element_type=jnp.float32)

    # ---- causal predicate built in-kernel (no mask input / DMA) ----
    rows = lax.broadcasted_iota(jnp.int32, (Bt, P, P), 1)
    cols = lax.broadcasted_iota(jnp.int32, (Bt, P, P), 2)
    causal = cols <= rows                           # (Bt, P, P) bool

    # ---- attention core: static head loop, batched over Bt ----
    attn_out = jnp.zeros((M, D), jnp.float32)
    for h in range(H):
        lo = h * dh
        qh = q[:, lo:lo + dh].reshape(Bt, P, dh).astype(cdt)
        kh = k[:, lo:lo + dh].reshape(Bt, P, dh).astype(cdt)
        vh = v[:, lo:lo + dh].reshape(Bt, P, dh).astype(cdt)

        s = jnp.einsum('bqd,bkd->bqk', qh, kh,
                       preferred_element_type=jnp.float32)          # (Bt,P,P)
        s = jnp.where(causal, s, jnp.float32(-1e10))

        m = jnp.max(s, axis=-1, keepdims=True)
        e = jnp.exp(s - m)
        denom = jnp.sum(e, axis=-1, keepdims=True)
        p = e * pl.reciprocal(denom, approx=True)                   # (Bt,P,P)

        z = jnp.einsum('bqk,bkd->bqd', p.astype(cdt), vh,
                       preferred_element_type=jnp.float32)          # (Bt,P,dh)
        attn_out = attn_out + jnp.dot(z.reshape(M, dh).astype(cdt), wo_ref[h],
                                      preferred_element_type=jnp.float32)

    resid_mid = xf + attn_out                       # f32 residual add

    # ---- MLP (ReLU) ----
    pre = jnp.dot(resid_mid.astype(cdt), win_ref[...],
                  preferred_element_type=jnp.float32) + bin_ref[...]   # (M,d_mlp)
    post = jnp.maximum(pre, 0.0)
    mlp_out = jnp.dot(post.astype(cdt), wout_ref[...],
                      preferred_element_type=jnp.float32) + bout_ref[...]

    resid_ref[...] = (resid_mid + mlp_out).reshape(Bt, P, D)


# ----------------------------------------------------------------------------
# Separate lane-dense tiled unembed kernel
# ----------------------------------------------------------------------------
def unembed_kernel(x_ref, wu_ref, out_ref):
    out_ref[...] = jnp.dot(x_ref[...].astype(wu_ref.dtype), wu_ref[...],
                           preferred_element_type=jnp.float32
                           ).astype(out_ref.dtype)


# ----------------------------------------------------------------------------
# One-time parameter preparation (outside the forward hot path)
# ----------------------------------------------------------------------------
def prepare_params(params, num_heads, d_head, compute_dtype=jnp.bfloat16):
    """Fold / stack weights once. compute_dtype=bf16 -> bf16 MXU inputs."""
    blocks = params["blocks"]
    D = params["W_E"].shape[0]
    H, dh = num_heads, d_head
    scale = 1.0 / math.sqrt(dh)
    c = lambda a: a.astype(compute_dtype)

    def fold_qkv(w):  # (H, dh, D) -> (D, H*dh), column order = h*dh + e
        return jnp.transpose(w, (2, 0, 1)).reshape(D, H * dh)

    wq = jnp.stack([fold_qkv(b["W_Q"]) * scale for b in blocks])   # (L,D,H*dh)
    wk = jnp.stack([fold_qkv(b["W_K"]) for b in blocks])
    wv = jnp.stack([fold_qkv(b["W_V"]) for b in blocks])
    wo = jnp.stack([jnp.transpose(b["W_O"].reshape(D, H, dh), (1, 2, 0))
                    for b in blocks])                              # (L,H,dh,D)
    win = jnp.stack([b["W_in"].T for b in blocks])                 # (L,D,d_mlp)
    b_in = jnp.stack([b["b_in"][None, :] for b in blocks])         # (L,1,d_mlp)
    wout = jnp.stack([b["W_out"].T for b in blocks])               # (L,d_mlp,D)
    b_out = jnp.stack([b["b_out"][None, :] for b in blocks])       # (L,1,D)

    W_U = params["W_U"]                                            # (D, V)
    V = W_U.shape[1]
    V_pad = ((V + 127) // 128) * 128
    wu = jnp.zeros((D, V_pad), jnp.float32).at[:, :V].set(W_U)

    return {
        "W_E_T": params["W_E"].T.astype(jnp.float32),  # (V, D) gather table
        "W_pos": params["W_pos"].astype(jnp.float32),
        "wq": c(wq), "wk": c(wk), "wv": c(wv), "wo": c(wo),
        "win": c(win), "b_in": b_in.astype(jnp.float32),
        "wout": c(wout), "b_out": b_out.astype(jnp.float32),
        "wu": c(wu),
    }


def _pick_tile(n, candidates):
    for cand in candidates:
        if n % cand == 0:
            return cand
    return n


def _default_batch_block(B):
    # Keep >=2 batch blocks (feeds both v7x TCs on the "parallel" axis) while
    # still amortizing layer-weight DMA across Bt rows.
    if B % 2 == 0 and B >= 2:
        return B // 2
    return B


# ----------------------------------------------------------------------------
# Forward pass: one fused layers pallas_call + one tiled unembed pallas_call
# ----------------------------------------------------------------------------
@functools.partial(jax.jit, static_argnames=("d_vocab", "batch_block"))
def transformer_forward(tokens, prep, *, d_vocab, batch_block=None):
    B, P = tokens.shape
    L, D, HDh = prep["wq"].shape
    H, dh = prep["wo"].shape[1], prep["wo"].shape[2]
    d_mlp = prep["win"].shape[-1]
    V_pad = prep["wu"].shape[-1]

    Bt = batch_block if batch_block is not None else _default_batch_block(B)
    assert B % Bt == 0
    nb = B // Bt

    # Glue: token-embedding gather + positional embedding (tiny, XLA).
    x0 = prep["W_E_T"][tokens] + prep["W_pos"][:P]          # (B, P, D) f32

    kernel = functools.partial(fused_layers_kernel, num_heads=H, d_head=dh)

    resid = pl.pallas_call(
        kernel,
        out_shape=jax.ShapeDtypeStruct((B, P, D), jnp.float32),
        grid=(nb, L),
        in_specs=[
            pl.BlockSpec((Bt, P, D), lambda b, l: (b, 0, 0)),           # x0
            pl.BlockSpec((None, D, HDh), lambda b, l: (l, 0, 0)),       # W_Q
            pl.BlockSpec((None, D, HDh), lambda b, l: (l, 0, 0)),       # W_K
            pl.BlockSpec((None, D, HDh), lambda b, l: (l, 0, 0)),       # W_V
            pl.BlockSpec((None, H, dh, D), lambda b, l: (l, 0, 0, 0)),  # W_O
            pl.BlockSpec((None, D, d_mlp), lambda b, l: (l, 0, 0)),     # W_in
            pl.BlockSpec((None, 1, d_mlp), lambda b, l: (l, 0, 0)),     # b_in
            pl.BlockSpec((None, d_mlp, D), lambda b, l: (l, 0, 0)),     # W_out
            pl.BlockSpec((None, 1, D), lambda b, l: (l, 0, 0)),         # b_out
        ],
        out_specs=pl.BlockSpec((Bt, P, D), lambda b, l: (b, 0, 0)),
        compiler_params=pltpu.CompilerParams(
            dimension_semantics=("parallel", "arbitrary")),
    )(x0, prep["wq"], prep["wk"], prep["wv"], prep["wo"],
      prep["win"], prep["b_in"], prep["wout"], prep["b_out"])

    # ---- unembed: separate lane-dense matmul, tiled over rows x vocab ----
    BP = B * P
    resid_flat = resid.reshape(BP, D)
    tm = _pick_tile(BP, (512, 256, 128, 64, 32, 16, 8))
    tv = _pick_tile(V_pad, (1024, 512, 256, 128))
    logits_pad = pl.pallas_call(
        unembed_kernel,
        out_shape=jax.ShapeDtypeStruct((BP, V_pad), jnp.float32),
        grid=(BP // tm, V_pad // tv),
        in_specs=[pl.BlockSpec((tm, D), lambda i, j: (i, 0)),
                  pl.BlockSpec((D, tv), lambda i, j: (0, j))],
        out_specs=pl.BlockSpec((tm, tv), lambda i, j: (i, j)),
        compiler_params=pltpu.CompilerParams(
            dimension_semantics=("parallel", "parallel")),
    )(resid_flat, prep["wu"])

    return logits_pad.reshape(B, P, V_pad)[..., :d_vocab]   # (B, P, V)


# ----------------------------------------------------------------------------
# Plain-JAX reference (mirrors the PyTorch forward) for verification
# ----------------------------------------------------------------------------
def reference_forward(tokens, params, num_heads, d_head):
    x = params["W_E"].T[tokens]
    P = tokens.shape[-1]
    x = x + params["W_pos"][:P]
    mask = jnp.tril(jnp.ones((P, P), jnp.float32))
    for blk in params["blocks"]:
        k = jnp.einsum("ihd,bpd->biph", blk["W_K"], x)
        q = jnp.einsum("ihd,bpd->biph", blk["W_Q"], x)
        v = jnp.einsum("ihd,bpd->biph", blk["W_V"], x)
        scores = jnp.einsum("biph,biqh->biqp", k, q)
        scores = jnp.tril(scores) - 1e10 * (1.0 - mask)
        attn = jax.nn.softmax(scores / jnp.sqrt(jnp.float32(d_head)), axis=-1)
        z = jnp.einsum("biph,biqp->biqh", v, attn)
        B = x.shape[0]
        z_flat = jnp.transpose(z, (0, 2, 1, 3)).reshape(B, P, -1)
        attn_out = jnp.einsum("df,bqf->bqd", blk["W_O"], z_flat)
        x = x + attn_out
        pre = jnp.einsum("md,bpd->bpm", blk["W_in"], x) + blk["b_in"]
        post = jax.nn.relu(pre)
        mlp_out = jnp.einsum("dm,bpm->bpd", blk["W_out"], post) + blk["b_out"]
        x = x + mlp_out
    return x @ params["W_U"]


# ----------------------------------------------------------------------------
# Deterministic parameter construction (matches the nn.Module __init__ shapes)
# ----------------------------------------------------------------------------
def make_params(key, num_layers, d_vocab, d_model, d_mlp, d_head, num_heads, n_ctx):
    keys = jax.random.split(key, 3 + 6 * num_layers)
    ki = iter(keys)
    nrm = lambda k, shape, scale: (jax.random.normal(k, shape, jnp.float32)
                                   / jnp.sqrt(jnp.float32(scale)))
    params = {
        "W_E": nrm(next(ki), (d_model, d_vocab), d_model),
        "W_pos": nrm(next(ki), (n_ctx, d_model), d_model),
        "blocks": [],
    }
    for _ in range(num_layers):
        params["blocks"].append({
            "W_K": nrm(next(ki), (num_heads, d_head, d_model), d_model),
            "W_Q": nrm(next(ki), (num_heads, d_head, d_model), d_model),
            "W_V": nrm(next(ki), (num_heads, d_head, d_model), d_model),
            "W_O": nrm(next(ki), (d_model, d_head * num_heads), d_model),
            "W_in": nrm(next(ki), (d_mlp, d_model), d_model),
            "b_in": jnp.zeros((d_mlp,), jnp.float32),
            "W_out": nrm(next(ki), (d_model, d_mlp), d_model),
            "b_out": jnp.zeros((d_model,), jnp.float32),
        })
    params["W_U"] = nrm(next(ki), (d_model, d_vocab), d_vocab)
    return params


if __name__ == "__main__":
    # Small shapes consistent with the module (act_type="ReLU").
    num_layers = 2
    d_vocab = 16
    d_model = 32
    d_mlp = 64
    d_head = 8
    num_heads = 4
    n_ctx = 8
    B, P = 2, 8

    key = jax.random.PRNGKey(0)
    pkey, tkey = jax.random.split(key)
    params = make_params(pkey, num_layers, d_vocab, d_model, d_mlp,
                         d_head, num_heads, n_ctx)
    tokens = jax.random.randint(tkey, (B, P), 0, d_vocab, dtype=jnp.int32)

    ref = jax.block_until_ready(
        reference_forward(tokens, params, num_heads, d_head))

    # --- full-f32 MXU path (exact forward semantics) ---
    prep_f32 = prepare_params(params, num_heads, d_head,
                              compute_dtype=jnp.float32)
    logits = jax.block_until_ready(
        transformer_forward(tokens, prep_f32, d_vocab=d_vocab))
    assert logits.shape == (B, P, d_vocab), logits.shape
    assert jnp.allclose(logits, ref, atol=1e-2, rtol=1e-2), (
        "f32 mismatch, max abs err = "
        f"{float(jnp.max(jnp.abs(logits - ref)))}")

    # --- bf16-at-MXU path (v6e/v7x recommendation), loose sanity check ---
    prep_bf16 = prepare_params(params, num_heads, d_head,
                               compute_dtype=jnp.bfloat16)
    logits_bf16 = jax.block_until_ready(
        transformer_forward(tokens, prep_bf16, d_vocab=d_vocab))
    assert jnp.allclose(logits_bf16, ref, atol=1e-1, rtol=1e-1), (
        "bf16 mismatch, max abs err = "
        f"{float(jnp.max(jnp.abs(logits_bf16 - ref)))}")

    print("KERNEL_OK")
</pallas_src>

<mosaic_0001>
module attributes {stable_mosaic.version = 11 : i64} {
  func.func @unembed_kernel(%arg0: i32, %arg1: i32, %arg2: memref<16x32xf32, #tpu.memory_space<vmem>>, %arg3: memref<32x128xf32, #tpu.memory_space<vmem>>, %arg4: memref<16x128xf32, #tpu.memory_space<vmem>>) attributes {dimension_semantics = [#tpu.dimension_semantics<parallel>, #tpu.dimension_semantics<parallel>], iteration_bounds = array<i64: 1, 1>, scalar_prefetch = 0 : i64, scratch_operands = 0 : i64, tpu.core_type = #tpu.core_type<tc>, window_params = [{transform_indices = @transform_0, window_bounds = array<i64: 16, 32>}, {transform_indices = @transform_1, window_bounds = array<i64: 32, 128>}, {transform_indices = @transform_2, window_bounds = array<i64: 16, 128>}]} {
    %c0 = arith.constant 0 : index
    %c0_0 = arith.constant 0 : index
    %0 = vector.load %arg2[%c0, %c0_0] : memref<16x32xf32, #tpu.memory_space<vmem>>, vector<16x32xf32>
    %c0_1 = arith.constant 0 : index
    %c0_2 = arith.constant 0 : index
    %1 = vector.load %arg3[%c0_1, %c0_2] : memref<32x128xf32, #tpu.memory_space<vmem>>, vector<32x128xf32>
    %cst = arith.constant dense<0.000000e+00> : vector<16x128xf32>
    %2 = tpu.matmul %0, %1, %cst {dimension_numbers = #tpu.dot_dimension_numbers<[1], [0], [0], [1], [0, 0, 1, 1], [], []>} : vector<16x32xf32>, vector<32x128xf32>, vector<16x128xf32> -> vector<16x128xf32>
    %c0_3 = arith.constant 0 : index
    %c0_4 = arith.constant 0 : index
    %3 = vector.load %arg4[%c0_3, %c0_4] : memref<16x128xf32, #tpu.memory_space<vmem>>, vector<16x128xf32>
    tpu.vector_store %arg4[%c0_3, %c0_4], %2 {strides = array<i32>} : memref<16x128xf32, #tpu.memory_space<vmem>>, vector<16x128xf32>,
    return
  }
  func.func @transform_0(%arg0: i32, %arg1: i32) -> (i32, i32) {
    %c0_i32 = arith.constant 0 : i32
    %c0_i32_0 = arith.constant 0 : i32
    return %arg0, %c0_i32 : i32, i32
  }
  func.func @transform_1(%arg0: i32, %arg1: i32) -> (i32, i32) {
    %c0_i32 = arith.constant 0 : i32
    %c0_i32_0 = arith.constant 0 : i32
    return %c0_i32, %arg1 : i32, i32
  }
  func.func @transform_2(%arg0: i32, %arg1: i32) -> (i32, i32) {
    %c0_i32 = arith.constant 0 : i32
    return %arg0, %arg1 : i32, i32
  }
}

module attributes {stable_mosaic.version = 11 : i64} {
  func.func @fused_layers_kernel(%arg0: i32, %arg1: i32, %arg2: memref<1x8x32xf32, #tpu.memory_space<vmem>>, %arg3: memref<1x32x32xf32, #tpu.memory_space<vmem>>, %arg4: memref<1x32x32xf32, #tpu.memory_space<vmem>>, %arg5: memref<1x32x32xf32, #tpu.memory_space<vmem>>, %arg6: memref<1x4x8x32xf32, #tpu.memory_space<vmem>>, %arg7: memref<1x32x64xf32, #tpu.memory_space<vmem>>, %arg8: memref<1x1x64xf32, #tpu.memory_space<vmem>>, %arg9: memref<1x64x32xf32, #tpu.memory_space<vmem>>, %arg10: memref<1x1x32xf32, #tpu.memory_space<vmem>>, %arg11: memref<1x8x32xf32, #tpu.memory_space<vmem>>) attributes {dimension_semantics = [#tpu.dimension_semantics<parallel>, #tpu.dimension_semantics<arbitrary>], iteration_bounds = array<i64: 2, 2>, scalar_prefetch = 0 : i64, scratch_operands = 0 : i64, tpu.core_type = #tpu.core_type<tc>, window_params = [{transform_indices = @transform_0, window_bounds = array<i64: 1, 8, 32>}, {transform_indices = @transform_1, window_bounds = array<i64: 1, 32, 32>}, {transform_indices = @transform_2, window_bounds = array<i64: 1, 32, 32>}, {transform_indices = @transform_3, window_bounds = array<i64: 1, 32, 32>}, {transform_indices = @transform_4, window_bounds = array<i64: 1, 4, 8, 32>}, {transform_indices = @transform_5, window_bounds = array<i64: 1, 32, 64>}, {transform_indices = @transform_6, window_bounds = array<i64: 1, 1, 64>}, {transform_indices = @transform_7, window_bounds = array<i64: 1, 64, 32>}, {transform_indices = @transform_8, window_bounds = array<i64: 1, 1, 32>}, {transform_indices = @transform_9, window_bounds = array<i64: 1, 8, 32>}]} {
    %c0_i32 = arith.constant 0 : i32
    %0 = arith.cmpi eq, %arg1, %c0_i32 : i32
    %1 = arith.extui %0 : i1 to i32
    %c0_i32_0 = arith.constant 0 : i32
    %2 = arith.cmpi ne, %1, %c0_i32_0 : i32
    scf.if %2 {
      %c0_70 = arith.constant 0 : index
      %c0_71 = arith.constant 0 : index
      %c0_72 = arith.constant 0 : index
      %138 = vector.load %arg2[%c0_70, %c0_71, %c0_72] : memref<1x8x32xf32, #tpu.memory_space<vmem>>, vector<1x8x32xf32>
      %c0_73 = arith.constant 0 : index
      %c0_74 = arith.constant 0 : index
      %c0_75 = arith.constant 0 : index
      %139 = vector.load %arg11[%c0_73, %c0_74, %c0_75] : memref<1x8x32xf32, #tpu.memory_space<vmem>>, vector<1x8x32xf32>
      tpu.vector_store %arg11[%c0_73, %c0_74, %c0_75], %138 {strides = array<i32>} : memref<1x8x32xf32, #tpu.memory_space<vmem>>, vector<1x8x32xf32>,
    } else {
    }
    %c0 = arith.constant 0 : index
    %c0_1 = arith.constant 0 : index
    %c0_2 = arith.constant 0 : index
    %3 = vector.load %arg11[%c0, %c0_1, %c0_2] : memref<1x8x32xf32, #tpu.memory_space<vmem>>, vector<1x8x32xf32>
    %4 = vector.shape_cast %3 : vector<1x8x32xf32> to vector<8x32xf32>
    %c0_3 = arith.constant 0 : index
    %c0_4 = arith.constant 0 : index
    %c0_5 = arith.constant 0 : index
    %5 = vector.load %arg3[%c0_3, %c0_4, %c0_5] : memref<1x32x32xf32, #tpu.memory_space<vmem>>, vector<1x32x32xf32>
    %6 = vector.shape_cast %5 : vector<1x32x32xf32> to vector<32x32xf32>
    %cst = arith.constant dense<0.000000e+00> : vector<8x32xf32>
    %7 = tpu.matmul %4, %6, %cst {dimension_numbers = #tpu.dot_dimension_numbers<[1], [0], [0], [1], [0, 0, 1, 1], [], []>} : vector<8x32xf32>, vector<32x32xf32>, vector<8x32xf32> -> vector<8x32xf32>
    %c0_6 = arith.constant 0 : index
    %c0_7 = arith.constant 0 : index
    %c0_8 = arith.constant 0 : index
    %8 = vector.load %arg4[%c0_6, %c0_7, %c0_8] : memref<1x32x32xf32, #tpu.memory_space<vmem>>, vector<1x32x32xf32>
    %9 = vector.shape_cast %8 : vector<1x32x32xf32> to vector<32x32xf32>
    %cst_9 = arith.constant dense<0.000000e+00> : vector<8x32xf32>
    %10 = tpu.matmul %4, %9, %cst_9 {dimension_numbers = #tpu.dot_dimension_numbers<[1], [0], [0], [1], [0, 0, 1, 1], [], []>} : vector<8x32xf32>, vector<32x32xf32>, vector<8x32xf32> -> vector<8x32xf32>
    %c0_10 = arith.constant 0 : index
    %c0_11 = arith.constant 0 : index
    %c0_12 = arith.constant 0 : index
    %11 = vector.load %arg5[%c0_10, %c0_11, %c0_12] : memref<1x32x32xf32, #tpu.memory_space<vmem>>, vector<1x32x32xf32>
    %12 = vector.shape_cast %11 : vector<1x32x32xf32> to vector<32x32xf32>
    %cst_13 = arith.constant dense<0.000000e+00> : vector<8x32xf32>
    %13 = tpu.matmul %4, %12, %cst_13 {dimension_numbers = #tpu.dot_dimension_numbers<[1], [0], [0], [1], [0, 0, 1, 1], [], []>} : vector<8x32xf32>, vector<32x32xf32>, vector<8x32xf32> -> vector<8x32xf32>
    %14 = tpu.iota {dimensions = array<i32: 1>} : vector<1x8x8xi32>
    %15 = tpu.iota {dimensions = array<i32: 2>} : vector<1x8x8xi32>
    %16 = arith.cmpi sle, %15, %14 : vector<1x8x8xi32>
    %cst_14 = arith.constant 0.000000e+00 : f32
    %17 = vector.broadcast %cst_14 : f32 to vector<8x32xf32>
    %18 = vector.extract_strided_slice %7 {offsets = [0, 0], sizes = [8, 8], strides = [1, 1]} : vector<8x32xf32> to vector<8x8xf32>
    %19 = vector.shape_cast %18 : vector<8x8xf32> to vector<1x8x8xf32>
    %20 = vector.extract_strided_slice %10 {offsets = [0, 0], sizes = [8, 8], strides = [1, 1]} : vector<8x32xf32> to vector<8x8xf32>
    %21 = vector.shape_cast %20 : vector<8x8xf32> to vector<1x8x8xf32>
    %22 = vector.extract_strided_slice %13 {offsets = [0, 0], sizes = [8, 8], strides = [1, 1]} : vector<8x32xf32> to vector<8x8xf32>
    %23 = vector.shape_cast %22 : vector<8x8xf32> to vector<1x8x8xf32>
    "tpu.trace_start"() <{level = 10 : i32, message = "bqd,bkd->bqk"}> : () -> ()
    %cst_15 = arith.constant dense<0.000000e+00> : vector<1x8x8xf32>
    %24 = tpu.matmul %19, %21, %cst_15 {dimension_numbers = #tpu.dot_dimension_numbers<[2], [2], [1], [1], [0, 0, 0, 1, 1, 1], [0], [0]>} : vector<1x8x8xf32>, vector<1x8x8xf32>, vector<1x8x8xf32> -> vector<1x8x8xf32>
    %cst_16 = arith.constant -1.000000e+10 : f32
    "tpu.trace_stop"() : () -> ()
    %25 = vector.broadcast %cst_16 : f32 to vector<1x8x8xf32>
    %26 = arith.select %16, %24, %25 : vector<1x8x8xi1>, vector<1x8x8xf32>
    %cst_17 = arith.constant dense<0xFF800000> : vector<1x8xf32>
    %27 = vector.multi_reduction <maximumf>, %26, %cst_17 [2] : vector<1x8x8xf32> to vector<1x8xf32>
    %28 = vector.shape_cast %27 : vector<1x8xf32> to vector<1x8x1xf32>
    %29 = vector.broadcast %28 : vector<1x8x1xf32> to vector<1x8x8xf32>
    %30 = arith.subf %26, %29 : vector<1x8x8xf32>
    %31 = math.exp %30 : vector<1x8x8xf32>
    %cst_18 = arith.constant dense<0.000000e+00> : vector<1x8xf32>
    %32 = vector.multi_reduction <add>, %31, %cst_18 [2] : vector<1x8x8xf32> to vector<1x8xf32>
    %33 = vector.shape_cast %32 : vector<1x8xf32> to vector<1x8x1xf32>
    %34 = tpu.reciprocal %33 {approx = true} : vector<1x8x1xf32> -> vector<1x8x1xf32>
    %35 = vector.broadcast %34 : vector<1x8x1xf32> to vector<1x8x8xf32>
    %36 = arith.mulf %31, %35 : vector<1x8x8xf32>
    "tpu.trace_start"() <{level = 10 : i32, message = "bqk,bkd->bqd"}> : () -> ()
    %cst_19 = arith.constant dense<0.000000e+00> : vector<1x8x8xf32>
    %37 = tpu.matmul %36, %23, %cst_19 {dimension_numbers = #tpu.dot_dimension_numbers<[2], [1], [1], [2], [0, 0, 0, 1, 1, 2], [0], [0]>} : vector<1x8x8xf32>, vector<1x8x8xf32>, vector<1x8x8xf32> -> vector<1x8x8xf32>
    "tpu.trace_stop"() : () -> ()
    %38 = vector.shape_cast %37 : vector<1x8x8xf32> to vector<8x8xf32>
    %c0_20 = arith.constant 0 : index
    %c0_21 = arith.constant 0 : index
    %c0_22 = arith.constant 0 : index
    %c0_23 = arith.constant 0 : index
    %39 = vector.load %arg6[%c0_20, %c0_21, %c0_22, %c0_23] : memref<1x4x8x32xf32, #tpu.memory_space<vmem>>, vector<1x1x8x32xf32>
    %40 = vector.shape_cast %39 : vector<1x1x8x32xf32> to vector<8x32xf32>
    %cst_24 = arith.constant dense<0.000000e+00> : vector<8x32xf32>
    %41 = tpu.matmul %38, %40, %cst_24 {dimension_numbers = #tpu.dot_dimension_numbers<[1], [0], [0], [1], [0, 0, 1, 1], [], []>} : vector<8x8xf32>, vector<8x32xf32>, vector<8x32xf32> -> vector<8x32xf32>
    %42 = arith.addf %17, %41 : vector<8x32xf32>
    %43 = vector.extract_strided_slice %7 {offsets = [0, 8], sizes = [8, 8], strides = [1, 1]} : vector<8x32xf32> to vector<8x8xf32>
    %44 = vector.shape_cast %43 : vector<8x8xf32> to vector<1x8x8xf32>
    %45 = vector.extract_strided_slice %10 {offsets = [0, 8], sizes = [8, 8], strides = [1, 1]} : vector<8x32xf32> to vector<8x8xf32>
    %46 = vector.shape_cast %45 : vector<8x8xf32> to vector<1x8x8xf32>
    %47 = vector.extract_strided_slice %13 {offsets = [0, 8], sizes = [8, 8], strides = [1, 1]} : vector<8x32xf32> to vector<8x8xf32>
    %48 = vector.shape_cast %47 : vector<8x8xf32> to vector<1x8x8xf32>
    "tpu.trace_start"() <{level = 10 : i32, message = "bqd,bkd->bqk"}> : () -> ()
    %cst_25 = arith.constant dense<0.000000e+00> : vector<1x8x8xf32>
    %49 = tpu.matmul %44, %46, %cst_25 {dimension_numbers = #tpu.dot_dimension_numbers<[2], [2], [1], [1], [0, 0, 0, 1, 1, 1], [0], [0]>} : vector<1x8x8xf32>, vector<1x8x8xf32>, vector<1x8x8xf32> -> vector<1x8x8xf32>
    %cst_26 = arith.constant -1.000000e+10 : f32
    "tpu.trace_stop"() : () -> ()
    %50 = vector.broadcast %cst_26 : f32 to vector<1x8x8xf32>
    %51 = arith.select %16, %49, %50 : vector<1x8x8xi1>, vector<1x8x8xf32>
    %cst_27 = arith.constant dense<0xFF800000> : vector<1x8xf32>
    %52 = vector.multi_reduction <maximumf>, %51, %cst_27 [2] : vector<1x8x8xf32> to vector<1x8xf32>
    %53 = vector.shape_cast %52 : vector<1x8xf32> to vector<1x8x1xf32>
    %54 = vector.broadcast %53 : vector<1x8x1xf32> to vector<1x8x8xf32>
    %55 = arith.subf %51, %54 : vector<1x8x8xf32>
    %56 = math.exp %55 : vector<1x8x8xf32>
    %cst_28 = arith.constant dense<0.000000e+00> : vector<1x8xf32>
    %57 = vector.multi_reduction <add>, %56, %cst_28 [2] : vector<1x8x8xf32> to vector<1x8xf32>
    %58 = vector.shape_cast %57 : vector<1x8xf32> to vector<1x8x1xf32>
    %59 = tpu.reciprocal %58 {approx = true} : vector<1x8x1xf32> -> vector<1x8x1xf32>
    %60 = vector.broadcast %59 : vector<1x8x1xf32> to vector<1x8x8xf32>
    %61 = arith.mulf %56, %60 : vector<1x8x8xf32>
    "tpu.trace_start"() <{level = 10 : i32, message = "bqk,bkd->bqd"}> : () -> ()
    %cst_29 = arith.constant dense<0.000000e+00> : vector<1x8x8xf32>
    %62 = tpu.matmul %61, %48, %cst_29 {dimension_numbers = #tpu.dot_dimension_numbers<[2], [1], [1], [2], [0, 0, 0, 1, 1, 2], [0], [0]>} : vector<1x8x8xf32>, vector<1x8x8xf32>, vector<1x8x8xf32> -> vector<1x8x8xf32>
    "tpu.trace_stop"() : () -> ()
    %63 = vector.shape_cast %62 : vector<1x8x8xf32> to vector<8x8xf32>
    %c0_30 = arith.constant 0 : index
    %c1 = arith.constant 1 : index
    %c0_31 = arith.constant 0 : index
    %c0_32 = arith.constant 0 : index
    %64 = vector.load %arg6[%c0_30, %c1, %c0_31, %c0_32] : memref<1x4x8x32xf32, #tpu.memory_space<vmem>>, vector<1x1x8x32xf32>
    %65 = vector.shape_cast %64 : vector<1x1x8x32xf32> to vector<8x32xf32>
    %cst_33 = arith.constant dense<0.000000e+00> : vector<8x32xf32>
    %66 = tpu.matmul %63, %65, %cst_33 {dimension_numbers = #tpu.dot_dimension_numbers<[1], [0], [0], [1], [0, 0, 1, 1], [], []>} : vector<8x8xf32>, vector<8x32xf32>, vector<8x32xf32> -> vector<8x32xf32>
    %67 = arith.addf %42, %66 : vector<8x32xf32>
    %68 = vector.extract_strided_slice %7 {offsets = [0, 16], sizes = [8, 8], strides = [1, 1]} : vector<8x32xf32> to vector<8x8xf32>
    %69 = vector.shape_cast %68 : vector<8x8xf32> to vector<1x8x8xf32>
    %70 = vector.extract_strided_slice %10 {offsets = [0, 16], sizes = [8, 8], strides = [1, 1]} : vector<8x32xf32> to vector<8x8xf32>
    %71 = vector.shape_cast %70 : vector<8x8xf32> to vector<1x8x8xf32>
    %72 = vector.extract_strided_slice %13 {offsets = [0, 16], sizes = [8, 8], strides = [1, 1]} : vector<8x32xf32> to vector<8x8xf32>
    %73 = vector.shape_cast %72 : vector<8x8xf32> to vector<1x8x8xf32>
    "tpu.trace_start"() <{level = 10 : i32, message = "bqd,bkd->bqk"}> : () -> ()
    %cst_34 = arith.constant dense<0.000000e+00> : vector<1x8x8xf32>
    %74 = tpu.matmul %69, %71, %cst_34 {dimension_numbers = #tpu.dot_dimension_numbers<[2], [2], [1], [1], [0, 0, 0, 1, 1, 1], [0], [0]>} : vector<1x8x8xf32>, vector<1x8x8xf32>, vector<1x8x8xf32> -> vector<1x8x8xf32>
    %cst_35 = arith.constant -1.000000e+10 : f32
    "tpu.trace_stop"() : () -> ()
    %75 = vector.broadcast %cst_35 : f32 to vector<1x8x8xf32>
    %76 = arith.select %16, %74, %75 : vector<1x8x8xi1>, vector<1x8x8xf32>
    %cst_36 = arith.constant dense<0xFF800000> : vector<1x8xf32>
    %77 = vector.multi_reduction <maximumf>, %76, %cst_36 [2] : vector<1x8x8xf32> to vector<1x8xf32>
    %78 = vector.shape_cast %77 : vector<1x8xf32> to vector<1x8x1xf32>
    %79 = vector.broadcast %78 : vector<1x8x1xf32> to vector<1x8x8xf32>
    %80 = arith.subf %76, %79 : vector<1x8x8xf32>
    %81 = math.exp %80 : vector<1x8x8xf32>
    %cst_37 = arith.constant dense<0.000000e+00> : vector<1x8xf32>
    %82 = vector.multi_reduction <add>, %81, %cst_37 [2] : vector<1x8x8xf32> to vector<1x8xf32>
    %83 = vector.shape_cast %82 : vector<1x8xf32> to vector<1x8x1xf32>
    %84 = tpu.reciprocal %83 {approx = true} : vector<1x8x1xf32> -> vector<1x8x1xf32>
    %85 = vector.broadcast %84 : vector<1x8x1xf32> to vector<1x8x8xf32>
    %86 = arith.mulf %81, %85 : vector<1x8x8xf32>
    "tpu.trace_start"() <{level = 10 : i32, message = "bqk,bkd->bqd"}> : () -> ()
    %cst_38 = arith.constant dense<0.000000e+00> : vector<1x8x8xf32>
    %87 = tpu.matmul %86, %73, %cst_38 {dimension_numbers = #tpu.dot_dimension_numbers<[2], [1], [1], [2], [0, 0, 0, 1, 1, 2], [0], [0]>} : vector<1x8x8xf32>, vector<1x8x8xf32>, vector<1x8x8xf32> -> vector<1x8x8xf32>
    "tpu.trace_stop"() : () -> ()
    %88 = vector.shape_cast %87 : vector<1x8x8xf32> to vector<8x8xf32>
    %c0_39 = arith.constant 0 : index
    %c2 = arith.constant 2 : index
    %c0_40 = arith.constant 0 : index
    %c0_41 = arith.constant 0 : index
    %89 = vector.load %arg6[%c0_39, %c2, %c0_40, %c0_41] : memref<1x4x8x32xf32, #tpu.memory_space<vmem>>, vector<1x1x8x32xf32>
    %90 = vector.shape_cast %89 : vector<1x1x8x32xf32> to vector<8x32xf32>
    %cst_42 = arith.constant dense<0.000000e+00> : vector<8x32xf32>
    %91 = tpu.matmul %88, %90, %cst_42 {dimension_numbers = #tpu.dot_dimension_numbers<[1], [0], [0], [1], [0, 0, 1, 1], [], []>} : vector<8x8xf32>, vector<8x32xf32>, vector<8x32xf32> -> vector<8x32xf32>
    %92 = arith.addf %67, %91 : vector<8x32xf32>
    %93 = vector.extract_strided_slice %7 {offsets = [0, 24], sizes = [8, 8], strides = [1, 1]} : vector<8x32xf32> to vector<8x8xf32>
    %94 = vector.shape_cast %93 : vector<8x8xf32> to vector<1x8x8xf32>
    %95 = vector.extract_strided_slice %10 {offsets = [0, 24], sizes = [8, 8], strides = [1, 1]} : vector<8x32xf32> to vector<8x8xf32>
    %96 = vector.shape_cast %95 : vector<8x8xf32> to vector<1x8x8xf32>
    %97 = vector.extract_strided_slice %13 {offsets = [0, 24], sizes = [8, 8], strides = [1, 1]} : vector<8x32xf32> to vector<8x8xf32>
    %98 = vector.shape_cast %97 : vector<8x8xf32> to vector<1x8x8xf32>
    "tpu.trace_start"() <{level = 10 : i32, message = "bqd,bkd->bqk"}> : () -> ()
    %cst_43 = arith.constant dense<0.000000e+00> : vector<1x8x8xf32>
    %99 = tpu.matmul %94, %96, %cst_43 {dimension_numbers = #tpu.dot_dimension_numbers<[2], [2], [1], [1], [0, 0, 0, 1, 1, 1], [0], [0]>} : vector<1x8x8xf32>, vector<1x8x8xf32>, vector<1x8x8xf32> -> vector<1x8x8xf32>
    %cst_44 = arith.constant -1.000000e+10 : f32
    "tpu.trace_stop"() : () -> ()
    %100 = vector.broadcast %cst_44 : f32 to vector<1x8x8xf32>
    %101 = arith.select %16, %99, %100 : vector<1x8x8xi1>, vector<1x8x8xf32>
    %cst_45 = arith.constant dense<0xFF800000> : vector<1x8xf32>
    %102 = vector.multi_reduction <maximumf>, %101, %cst_45 [2] : vector<1x8x8xf32> to vector<1x8xf32>
    %103 = vector.shape_cast %102 : vector<1x8xf32> to vector<1x8x1xf32>
    %104 = vector.broadcast %103 : vector<1x8x1xf32> to vector<1x8x8xf32>
    %105 = arith.subf %101, %104 : vector<1x8x8xf32>
    %106 = math.exp %105 : vector<1x8x8xf32>
    %cst_46 = arith.constant dense<0.000000e+00> : vector<1x8xf32>
    %107 = vector.multi_reduction <add>, %106, %cst_46 [2] : vector<1x8x8xf32> to vector<1x8xf32>
    %108 = vector.shape_cast %107 : vector<1x8xf32> to vector<1x8x1xf32>
    %109 = tpu.reciprocal %108 {approx = true} : vector<1x8x1xf32> -> vector<1x8x1xf32>
    %110 = vector.broadcast %109 : vector<1x8x1xf32> to vector<1x8x8xf32>
    %111 = arith.mulf %106, %110 : vector<1x8x8xf32>
    "tpu.trace_start"() <{level = 10 : i32, message = "bqk,bkd->bqd"}> : () -> ()
    %cst_47 = arith.constant dense<0.000000e+00> : vector<1x8x8xf32>
    %112 = tpu.matmul %111, %98, %cst_47 {dimension_numbers = #tpu.dot_dimension_numbers<[2], [1], [1], [2], [0, 0, 0, 1, 1, 2], [0], [0]>} : vector<1x8x8xf32>, vector<1x8x8xf32>, vector<1x8x8xf32> -> vector<1x8x8xf32>
    "tpu.trace_stop"() : () -> ()
    %113 = vector.shape_cast %112 : vector<1x8x8xf32> to vector<8x8xf32>
    %c0_48 = arith.constant 0 : index
    %c3 = arith.constant 3 : index
    %c0_49 = arith.constant 0 : index
    %c0_50 = arith.constant 0 : index
    %114 = vector.load %arg6[%c0_48, %c3, %c0_49, %c0_50] : memref<1x4x8x32xf32, #tpu.memory_space<vmem>>, vector<1x1x8x32xf32>
    %115 = vector.shape_cast %114 : vector<1x1x8x32xf32> to vector<8x32xf32>
    %cst_51 = arith.constant dense<0.000000e+00> : vector<8x32xf32>
    %116 = tpu.matmul %113, %115, %cst_51 {dimension_numbers = #tpu.dot_dimension_numbers<[1], [0], [0], [1], [0, 0, 1, 1], [], []>} : vector<8x8xf32>, vector<8x32xf32>, vector<8x32xf32> -> vector<8x32xf32>
    %117 = arith.addf %92, %116 : vector<8x32xf32>
    %118 = arith.addf %4, %117 : vector<8x32xf32>
    %c0_52 = arith.constant 0 : index
    %c0_53 = arith.constant 0 : index
    %c0_54 = arith.constant 0 : index
    %119 = vector.load %arg7[%c0_52, %c0_53, %c0_54] : memref<1x32x64xf32, #tpu.memory_space<vmem>>, vector<1x32x64xf32>
    %120 = vector.shape_cast %119 : vector<1x32x64xf32> to vector<32x64xf32>
    %cst_55 = arith.constant dense<0.000000e+00> : vector<8x64xf32>
    %121 = tpu.matmul %118, %120, %cst_55 {dimension_numbers = #tpu.dot_dimension_numbers<[1], [0], [0], [1], [0, 0, 1, 1], [], []>} : vector<8x32xf32>, vector<32x64xf32>, vector<8x64xf32> -> vector<8x64xf32>
    %c0_56 = arith.constant 0 : index
    %c0_57 = arith.constant 0 : index
    %c0_58 = arith.constant 0 : index
    %122 = vector.load %arg8[%c0_56, %c0_57, %c0_58] : memref<1x1x64xf32, #tpu.memory_space<vmem>>, vector<1x1x64xf32>
    %123 = vector.shape_cast %122 : vector<1x1x64xf32> to vector<1x64xf32>
    %124 = vector.broadcast %123 : vector<1x64xf32> to vector<8x64xf32>
    %125 = arith.addf %121, %124 : vector<8x64xf32>
    %cst_59 = arith.constant 0.000000e+00 : f32
    %126 = vector.broadcast %cst_59 : f32 to vector<8x64xf32>
    %127 = arith.maximumf %125, %126 : vector<8x64xf32>
    %c0_60 = arith.constant 0 : index
    %c0_61 = arith.constant 0 : index
    %c0_62 = arith.constant 0 : index
    %128 = vector.load %arg9[%c0_60, %c0_61, %c0_62] : memref<1x64x32xf32, #tpu.memory_space<vmem>>, vector<1x64x32xf32>
    %129 = vector.shape_cast %128 : vector<1x64x32xf32> to vector<64x32xf32>
    %cst_63 = arith.constant dense<0.000000e+00> : vector<8x32xf32>
    %130 = tpu.matmul %127, %129, %cst_63 {dimension_numbers = #tpu.dot_dimension_numbers<[1], [0], [0], [1], [0, 0, 1, 1], [], []>} : vector<8x64xf32>, vector<64x32xf32>, vector<8x32xf32> -> vector<8x32xf32>
    %c0_64 = arith.constant 0 : index
    %c0_65 = arith.constant 0 : index
    %c0_66 = arith.constant 0 : index
    %131 = vector.load %arg10[%c0_64, %c0_65, %c0_66] : memref<1x1x32xf32, #tpu.memory_space<vmem>>, vector<1x1x32xf32>
    %132 = vector.shape_cast %131 : vector<1x1x32xf32> to vector<1x32xf32>
    %133 = vector.broadcast %132 : vector<1x32xf32> to vector<8x32xf32>
    %134 = arith.addf %130, %133 : vector<8x32xf32>
    %135 = arith.addf %118, %134 : vector<8x32xf32>
    %136 = vector.shape_cast %135 : vector<8x32xf32> to vector<1x8x32xf32>
    %c0_67 = arith.constant 0 : index
    %c0_68 = arith.constant 0 : index
    %c0_69 = arith.constant 0 : index
    %137 = vector.load %arg11[%c0_67, %c0_68, %c0_69] : memref<1x8x32xf32, #tpu.memory_space<vmem>>, vector<1x8x32xf32>
    tpu.vector_store %arg11[%c0_67, %c0_68, %c0_69], %136 {strides = array<i32>} : memref<1x8x32xf32, #tpu.memory_space<vmem>>, vector<1x8x32xf32>,
    return
  }
  func.func @transform_0(%arg0: i32, %arg1: i32) -> (i32, i32, i32) {
    %c0_i32 = arith.constant 0 : i32
    %c0_i32_0 = arith.constant 0 : i32
    %c0_i32_1 = arith.constant 0 : i32
    return %arg0, %c0_i32, %c0_i32_0 : i32, i32, i32
  }
  func.func @transform_1(%arg0: i32, %arg1: i32) -> (i32, i32, i32) {
    %c0_i32 = arith.constant 0 : i32
    %c0_i32_0 = arith.constant 0 : i32
    %c0_i32_1 = arith.constant 0 : i32
    return %arg1, %c0_i32, %c0_i32_0 : i32, i32, i32
  }
  func.func @transform_2(%arg0: i32, %arg1: i32) -> (i32, i32, i32) {
    %c0_i32 = arith.constant 0 : i32
    %c0_i32_0 = arith.constant 0 : i32
    %c0_i32_1 = arith.constant 0 : i32
    return %arg1, %c0_i32, %c0_i32_0 : i32, i32, i32
  }
  func.func @transform_3(%arg0: i32, %arg1: i32) -> (i32, i32, i32) {
    %c0_i32 = arith.constant 0 : i32
    %c0_i32_0 = arith.constant 0 : i32
    %c0_i32_1 = arith.constant 0 : i32
    return %arg1, %c0_i32, %c0_i32_0 : i32, i32, i32
  }
  func.func @transform_4(%arg0: i32, %arg1: i32) -> (i32, i32, i32, i32) {
    %c0_i32 = arith.constant 0 : i32
    %c0_i32_0 = arith.constant 0 : i32
    %c0_i32_1 = arith.constant 0 : i32
    %c0_i32_2 = arith.constant 0 : i32
    return %arg1, %c0_i32, %c0_i32_0, %c0_i32_1 : i32, i32, i32, i32
  }
  func.func @transform_5(%arg0: i32, %arg1: i32) -> (i32, i32, i32) {
    %c0_i32 = arith.constant 0 : i32
    %c0_i32_0 = arith.constant 0 : i32
    %c0_i32_1 = arith.constant 0 : i32
    return %arg1, %c0_i32, %c0_i32_0 : i32, i32, i32
  }
  func.func @transform_6(%arg0: i32, %arg1: i32) -> (i32, i32, i32) {
    %c0_i32 = arith.constant 0 : i32
    %c0_i32_0 = arith.constant 0 : i32
    %c0_i32_1 = arith.constant 0 : i32
    return %arg1, %c0_i32, %c0_i32_0 : i32, i32, i32
  }
  func.func @transform_7(%arg0: i32, %arg1: i32) -> (i32, i32, i32) {
    %c0_i32 = arith.constant 0 : i32
    %c0_i32_0 = arith.constant 0 : i32
    %c0_i32_1 = arith.constant 0 : i32
    return %arg1, %c0_i32, %c0_i32_0 : i32, i32, i32
  }
  func.func @transform_8(%arg0: i32, %arg1: i32) -> (i32, i32, i32) {
    %c0_i32 = arith.constant 0 : i32
    %c0_i32_0 = arith.constant 0 : i32
    %c0_i32_1 = arith.constant 0 : i32
    return %arg1, %c0_i32, %c0_i32_0 : i32, i32, i32
  }
  func.func @transform_9(%arg0: i32, %arg1: i32) -> (i32, i32, i32) {
    %c0_i32 = arith.constant 0 : i32
    %c0_i32_0 = arith.constant 0 : i32
    %c0_i32_1 = arith.constant 0 : i32
    return %arg0, %c0_i32, %c0_i32_0 : i32, i32, i32
  }
}

</mosaic_0001>

<bundles_post_ra>
// kernel: transformer_forward.3
= control target key start
LH: loop header
LB: loop body
LE: loop exit
PB: predicated region body
PF: predicated region fallthrough
CT: control target
= control target key end

     0   :  { %vm18_vm0 = vcmask 261120   ;;  %s201_s0 = inlined_call_operand.vmem [shape: f32[16,32], index: 0, kind: input, shape index: {}]   ;;  %s202_s1 = inlined_call_operand.vmem [shape: f32[32,128], index: 1, kind: input, shape index: {}]   ;;  %s203_s2 = inlined_call_operand.hbm [shape: f32[16,128], index: 2, kind: output, shape index: {}]  }
   0x1   :  { %v17_v0 = vld [vmem:[%s202_s1 + $0x18] sm:$0xff]  ;;  %v16_v1 = vld [vmem:[%s202_s1 + $0x10] sm:$0xff]  ;;  %v12_v2 = vld [vmem:[%s201_s0] sm:$0xff] }
   0x2   :  { %126 = vmatprep.subr.mxu0 %v17_v0  ;;  %v15_v3 = vld [vmem:[%s202_s1 + $0x8] sm:$0xff]  ;;  %134 = vmatprep.mubr.msk.f32.mxu0 %vm18_vm0, %v12_v2 }
   0x3   :  { %127 = vmatpush3.msra.mxu0 %v17_v0 }
   0x4   :  { %7 = vsyncpa [#allocation3], 0  ;;  %128 = vmatprep.subr.mxu0 %v16_v1  ;;  %v14_v4 = vld [vmem:[%s202_s1] sm:$0xff]  ;;  %v13_v5 = vld [vmem:[%s201_s0 + $0x8] sm:$0xff]  ;;  %s162_s21 = smov [#allocation2]  }
   0x5   :  { %129 = vmatpush3.msra.mxu0 %v16_v1  ;;  %s107_s22 = sshll.u32 %s162_s21, 4  ;;  %s108_s22 = int_to_ptr.vmem [resolvable:$true] %s107_s22 }
   0x6   :  { %130 = vmatprep.subr.mxu0 %v15_v3  ;;  %s140_s23 = scalar_lea.vmem %s108_s22, 256  ;;  %p145_p1 = scmp.lt.s32.totalorder %s108_s22, %s108_s22 }
   0x7   :  { %131 = vmatpush3.msra.mxu0 %v15_v3  ;;  %p141_p0 = scmp.ne.s32.totalorder %s108_s22, %s140_s23  ;;  %p146_p2 = scmp.lt.s32.totalorder %s140_s23, %s140_s23 }
   0x8   :  { %132 = vmatprep.subr.mxu0 %v14_v4 }
   0x9   :  { %133 = vmatpush3.msra.mxu0 %v14_v4  ;;  %p147_p3 = por %p146_p2, %p145_p1 }
   0xa   :  { %135 = vmatmul.mubr.msk.f32.vlgmr.msra.gmra.mxu0 %vm18_vm0, %v13_v5 }
   0xb   :  { %p148_p4 = pnand %p147_p3, %p141_p0 }
  0xca   :  { %v136_v6 = vpop.f32.mrf.mxu0 }
  0xcb   :  { %101 = vst [vmem:[#allocation2 + $0x8] sm:$0xff] %v136_v6 }
  0xcc   :  { %v91_v7 = vpop.f32.mrf.mxu0 }
  0xcd   :  { %100 = vst [vmem:[#allocation2] sm:$0xff] %v91_v7 }
  0xce   :  { %151 = shalt.err (!%p148_p4)
}
  0xcf   :  { %s163_s1 = smov 128   ;;  %s164_s24 = smov 8  }
  0xd0   :  { %113 = dma.vmem_to_hbm [thread:$0]  %s108_s22, 256, %s203_s2, [#allocation3], %s163_s1, %s163_s1, %s164_s24  }
  0xd1   :  { %160 = dma.done.wait [#allocation3], 256  }
  0xd2   :  { %161 = vsyncadd [#allocation3], 4294967040 }
  0xd3   :  { %117 = vsyncpa [#allocation3], 1 }

// kernel: transformer_forward.2
= control target key start
LH: loop header
LB: loop body
LE: loop exit
PB: predicated region body
PF: predicated region fallthrough
CT: control target
= control target key end

     0   :  { %s2406_s30 = smov 0   ;;  %s2408_s10 = smov 0   ;;  %s2694_s0 = inlined_call_operand.vmem [shape: f32[2,8,32], index: 0, kind: input, shape index: {}]   ;;  %s2695_s1 = inlined_call_operand.vmem [shape: f32[2,32,32], index: 1, kind: input, shape index: {}]   ;;  %s2696_s2 = inlined_call_operand.vmem [shape: f32[2,32,32], index: 2, kind: input, shape index: {}]   ;;  %s2697_s3 = inlined_call_operand.vmem [shape: f32[2,32,32], index: 3, kind: input, shape index: {}]   ;;  %s2698_s4 = inlined_call_operand.vmem [shape: f32[2,4,8,32], index: 4, kind: input, shape index: {}]   ;;  %s2699_s5 = inlined_call_operand.vmem [shape: f32[2,32,64], index: 5, kind: input, shape index: {}]   ;;  %s2700_s6 = inlined_call_operand.vmem [shape: f32[2,1,64], index: 6, kind: input, shape index: {}]   ;;  %s2701_s7 = inlined_call_operand.vmem [shape: f32[2,64,32], index: 7, kind: input, shape index: {}]   ;;  %s2702_s8 = inlined_call_operand.vmem [shape: f32[2,1,32], index: 8, kind: input, shape index: {}]   ;;  %s2703_s9 = inlined_call_operand.vmem [shape: f32[2,8,32], index: 9, kind: output, shape index: {}]  }
   0x1   :  { %2705 = sst [smem:[#allocation5_spill]] %s2694_s0  ;;  %s2410_s11 = smov 0  }
   0x2   :  { %2706 = sst [smem:[#allocation6_spill]] %s2695_s1  ;;  %s2412_s12 = smov 0  }
   0x3   :  { %2707 = sst [smem:[#allocation7_spill]] %s2696_s2  ;;  %s2414_s13 = smov 0  }
   0x4   :  { %2708 = sst [smem:[#allocation8_spill]] %s2697_s3 }
   0x5   :  { %2709 = sst [smem:[#allocation9_spill]] %s2698_s4 }
   0x6 LB: > { %2710 = sst [smem:[#allocation2_spill]] %s2345_s12  ;;  %s28_s14 = sadd.s32 1, %s2341_s11  ;;  %s2349_s13 = sphi %s2414_s13, %s19_s13   ;;  %s2345_s12 = sphi %s2412_s12, %s2720_s12   ;;  %s2341_s11 = sphi %s2410_s11, %s2722_s11   ;;  %s2337_s10 = sphi %s2408_s10, %s2718_s10   ;;  %s2333_s30 = sphi %s2406_s30, %s2721_s30  }
   0x7   : > { %s31_s15 = sadd.s32 1, %s2345_s12  ;;  %p29_p0 = scmp.ge.s32.totalorder %s28_s14, 2 }
   0x8   : > { %p2024_p1 = scmp.ge.s32.totalorder %s2349_s13, 1  ;;  %p374_p2 = scmp.lt.s32.totalorder %s2349_s13, 5 }
   0x9   : > { %s2724_s14 = smov (%p29_p0, %s28_s14), 0  ;;  %s2726_s15 = smov (!%p29_p0, %s31_s15), %s2345_s12 }
   0xa   : > { %2711 = sst [smem:[#allocation3_spill]] %s2724_s14  ;;  %p375_p3 = pnand %p2024_p1, %p374_p2 }
   0xb   : > { %p33_p4 = scmp.ge.s32.totalorder %s2726_s15, 2  ;;  %p444_p5 = scmp.lt.s32.totalorder (!%p375_p3), %s2337_s10, 1 }
   0xc   : > { %378 = sbr.rel (%p375_p3) target bundleno = 2858 (0xb2a), region = 56  ;;  %p448_p6 = scmp.lt.s32.totalorder (!%p375_p3), %s2333_s30, 1 }
   0xd   : > { %s2728_s15 = smov (%p33_p4, %s2726_s15), 0  ;;  %s2713_s0 = sld [smem:[#allocation5_spill]] (!%p375_p3) }
   0xe   : > { %2712 = sst [smem:[#allocation4_spill]] %s2728_s15  ;;  %p2039_p7 = scmp.ne.s32.totalorder (!%p375_p3), %s2333_s30, 0 }
   0xf   : > { %s2714_s1 = sld [smem:[#allocation6_spill]] (!%p375_p3) }
  0x10   : > { %s2715_s2 = sld [smem:[#allocation7_spill]] (!%p375_p3) }
  0x11   : > { %s2730_s10 = smov (!%p444_p5, %s2337_s10), 1  ;;  %s2716_s3 = sld [smem:[#allocation8_spill]] }
  0x12   : > { %s2440_s16 = scalar_select %p448_p6, %s2333_s30, 1 }
  0x13   : > { %s2025_s17 = sshll.u32 %s2730_s10, 3  ;;  %s2717_s4 = sld [smem:[#allocation9_spill]] }
  0x14   : > { %s447_s20 = scalar_lea.vmem %s2713_s0, %s2025_s17  ;;  %s2068_s21 = sshll.u32 %s2440_s16, 5 }
  0x15   : > { %s2449_s24 = scalar_lea.vmem %s2714_s1, %s2068_s21  ;;  %s2469_s22 = scalar_lea.vmem %s2699_s5, %s2068_s21 }
  0x16   : > { %s2454_s27 = scalar_lea.vmem %s2715_s2, %s2068_s21  ;;  %s475_s25 = scalar_lea.vmem %s2700_s6, %s2440_s16 }
  0x17   : > { %s2459_s15 = scalar_lea.vmem %s2716_s3, %s2068_s21  ;;  %s2073_s26 = sshll.u32 %s2440_s16, 6 }
  0x18   : > { %s483_s28 = scalar_lea.vmem %s2702_s8, %s2440_s16  ;;  %s2483_s14 = scalar_lea.vmem %s2701_s7, %s2073_s26 }
  0x19   : > { %s2464_s18 = scalar_lea.vmem %s2717_s4, %s2068_s21  ;;  %s2488_s0 = scalar_lea.vmem %s2703_s9, %s2025_s17 }
  0x1a   : > { %491 = sbr.rel (%p2039_p7) target bundleno = 33 (0x21), region = 60 }
  0x1f   : > { %v492_v0 = vld [vmem:[%s447_s20] sm:$0xff]  ;;  %vm493_vm0 = vcmask 261120  }
  0x20   : > { %494 = vst.msk [vmem:[%s2488_s0] sm:$0xff] %vm493_vm0, %v492_v0 }
  0x21 PF: > { %v577_v1 = vld [vmem:[%s2454_s27 + $0x18] sm:$0xff]  ;;  %v2351_v3 = vmov 0.0   ;;  %v576_v4 = vld [vmem:[%s2454_s27 + $0x10] sm:$0xff]  ;;  %v575_v6 = vld [vmem:[%s2454_s27 + $0x8] sm:$0xff]  ;;  %vm500_vm1 = vcmask 261120   ;;  %vm2352_vm2 = vmmov 0   ;;  %v722_v23 = vlaneseq }
  0x22   : > { %v499_v2 = vld [vmem:[%s2449_s24 + $0x18] sm:$0xff]  ;;  %2138 = vmatprep.subr.mxu1 %v2351_v3  ;;  %2127 = vmatprep.subr.mxu0 %v2351_v3  ;;  %v498_v5 = vld [vmem:[%s2449_s24 + $0x10] sm:$0xff]  ;;  %v497_v7 = vld [vmem:[%s2449_s24 + $0x8] sm:$0xff]  ;;  %vm727_vm3 = vcmask 64512   ;;  %s2353_s1 = smov 120   ;;  %s2354_s2 = smov 112  }
  0x23   : > { %2139 = vmatpush3.msra.mxu1 %v577_v1  ;;  %2128 = vmatpush3.msra.mxu0 %v499_v2  ;;  %v574_v8 = vld [vmem:[%s2454_s27] sm:$0xff]  ;;  %v651_v11 = vld [vmem:[%s2459_s15 + $0x18] sm:$0xff]  ;;  %v650_v12 = vld [vmem:[%s2459_s15 + $0x10] sm:$0xff]  ;;  %v2561_v24 = vshrl.u32 %v722_v23, 7  ;;  %v2563_v25 = vand.u32 127, %v722_v23  ;;  %s2355_s3 = smov 104  }
  0x24   : > { %2140 = vmatprep.subr.mxu1 %v2351_v3  ;;  %2129 = vmatprep.subr.mxu0 %v2351_v3  ;;  %v496_v10 = vld [vmem:[%s2449_s24] sm:$0xff]  ;;  %v649_v13 = vld [vmem:[%s2459_s15 + $0x8] sm:$0xff]  ;;  %vm1790_vm5 = vcmask 523264  }
  0x25   : > { %2141 = vmatpush3.msra.mxu1 %v576_v4  ;;  %2130 = vmatpush3.msra.mxu0 %v498_v5  ;;  %v648_v14 = vld [vmem:[%s2459_s15] sm:$0xff]  ;;  %vm726_vm4 = vcmp.le.s32.totalorder %v2563_v25, %v2561_v24  ;;  %v2049_v47 = vld [vmem:[%s2464_s18 + $0x8] sm:$0xff] }
  0x26   : > { %2142 = vmatprep.subr.mxu1 %v2351_v3  ;;  %2131 = vmatprep.subr.mxu0 %v2351_v3  ;;  %v889_v52 = vld [vmem:[%s2464_s18] sm:$0xff] }
  0x27   : > { %2143 = vmatpush3.msra.mxu1 %v575_v6  ;;  %2132 = vmatpush3.msra.mxu0 %v497_v7  ;;  %v2506_v9 = vld [vmem:[%s2488_s0] sm:$0xff] }
  0x28   : > { %2144 = vmatprep.subr.mxu1 %v2351_v3  ;;  %2146 = vmatprep.mubr.msk.f32.mxu1 %vm2352_vm2, %v2351_v3 }
  0x29   : > { %2145 = vmatpush3.msra.mxu1 %v574_v8  ;;  %2133 = vmatprep.subr.mxu0 %v2351_v3 }
  0x2a   : > { %2147 = vmatmul.mubr.msk.f32.vlgmr.msra.gmra.mxu1 %vm500_vm1, %v2506_v9  ;;  %2134 = vmatpush3.msra.mxu0 %v496_v10 }
  0x2b   : > { %2135 = vmatprep.mubr.msk.f32.mxu0 %vm2352_vm2, %v2351_v3  ;;  %2149 = vmatprep.subr.mxu0 %v2351_v3 }
  0x2c   : > { %2136 = vmatmul.mubr.msk.f32.vlgmr.msra.gmra.mxu0 %vm500_vm1, %v2506_v9  ;;  %2165 = vmatprep.subr.mxu1 %v2351_v3 }
  0x2d   : > { %2150 = vmatpush3.msra.mxu0 %v651_v11  ;;  %2157 = vmatprep.mubr.msk.f32.mxu0 %vm2352_vm2, %v2351_v3 }
  0x2e   : > { %2151 = vmatprep.subr.mxu0 %v2351_v3  ;;  %2167 = vmatprep.mubr.msk.f32.mxu1 %vm2352_vm2, %v2351_v3 }
  0x2f   : > { %2152 = vmatpush3.msra.mxu0 %v650_v12 }
  0x30   : > { %2153 = vmatprep.subr.mxu0 %v2351_v3 }
  0x31   : > { %2154 = vmatpush3.msra.mxu0 %v649_v13 }
  0x32   : > { %2155 = vmatprep.subr.mxu0 %v2351_v3 }
  0x33   : > { %2156 = vmatpush3.msra.mxu0 %v648_v14 }
  0x34   : > { %2158 = vmatmul.mubr.msk.f32.vlgmr.msra.gmra.mxu0 %vm500_vm1, %v2506_v9  ;;  %2160 = vmatprep.subr.mxu0 %v2351_v3 }
  0x35   : > { %2162 = vmatprep.mubr.msk.f32.mxu0 %vm2352_vm2, %v2351_v3 }
  0xea   : > { %v2537_v15 = vpop.f32.mrf.mxu1 }
  0xeb   : > { %892 = vrot.lane.b32.xlu0 %v2537_v15, %s2353_s1  ;;  %2161 = vmatpush3.xpose.msk.msra.mxu0 %vm727_vm3, %v2537_v15 }
  0xec   : > { %v2543_v16 = vpop.f32.mrf.mxu0  ;;  %v2148_v17 = vpop.f32.mrf.mxu1  ;;  %2170 = vmatprep.subr.mxu0 %v2351_v3 }
  0xee   : > { %v2137_v18 = vpop.f32.mrf.mxu0  ;;  %2163 = vmatmul.mubr.msk.f32.vlgmr.msra.gmra.mxu0 %vm727_vm3, %v2543_v16 }
  0xef   : > { %890 = vrot.lane.b32.xlu0 %v2543_v16, %s2353_s1  ;;  %2172 = vmatprep.mubr.msk.f32.mxu0 %vm2352_vm2, %v2351_v3 }
  0xf4   : > { %v2552_v19 = vpop.f32.mrf.mxu0 }
  0xf5   : > { %2166 = vmatpush3.msra.mxu1 %v2552_v19 }
  0xf6   : > { %v2159_v20 = vpop.f32.mrf.mxu0  ;;  %2175 = vmatprep.subr.mxu1 %v2351_v3 }
 0x15d   : > { %v893_v21 = vpop.permute.xlu0 %892 }
 0x15e   : > { %2171 = vmatpush3.xpose.msk.msra.mxu0 %vm727_vm3, %v893_v21 }
 0x15f   : > { %2180 = vmatprep.subr.mxu0 %v2351_v3 }
 0x161   : > { %v891_v22 = vpop.permute.xlu0 %890 }
 0x162   : > { %2173 = vmatmul.mubr.msk.f32.vlgmr.msra.gmra.mxu0 %vm727_vm3, %v891_v22 }
 0x163   : > { %2182 = vmatprep.mubr.msk.f32.mxu0 %vm2352_vm2, %v2351_v3  ;;  %2181 = vmatpush3.msra.mxu0 %v2049_v47  ;;  %v1778_v47 = vld [vmem:[%s2483_s14 + $0x18] sm:$0xff] }
 0x164   : > { %2190 = vmatprep.subr.mxu0 %v2351_v3 }
 0x1ae   : > { %v800_v26 = vpop.f32.mrf.mxu0 }
 0x1af   : > { %v804_v27 = vsel %vm726_vm4, %v800_v26, -1e+10 }
 0x1b0   : > { %v2164_v28 = vpop.f32.mrf.mxu0  ;;  %v805_v29 = vsel %vm727_vm3, %v804_v27, -inf }
 0x1b1   : > { %806 = vmax.xlane.f32.xlu1 %v805_v29 }
 0x222   : > { %v964_v30 = vpop.f32.mrf.mxu0 }
 0x223   : > { %v968_v31 = vsel %vm726_vm4, %v964_v30, -1e+10 }
 0x224   : > { %v2174_v32 = vpop.f32.mrf.mxu0  ;;  %v969_v33 = vsel %vm727_vm3, %v968_v31, -inf }
 0x225   : > { %970 = vmax.xlane.f32.xlu1 %v969_v33 }
 0x23a   : > { %v807_v34 = vpop.xlane.xlu1 %806 }
 0x23b   : > { %v808_v35 = vsub.f32 %v804_v27, %v807_v34 }
 0x23d   : > { %v809_v36 = vmul.f32 1.442695, %v808_v35 }
 0x23f   : > { %2295 = vpow2.f32 %v809_v36 }
 0x24c   : > { %v2296_v37 = vpop.eup %2295 }
 0x24d   : > { %v811_v38 = vsel %vm727_vm3, %v2296_v37, 0.0 }
 0x24e   : > { %812 = vadd.xlane.f32.xlu0 %v811_v38 }
 0x264   : > { %1295 = vrot.lane.b32.xlu0 %v2552_v19, %s2354_s2 }
 0x2ae   : > { %v971_v39 = vpop.xlane.xlu1 %970 }
 0x2af   : > { %v972_v40 = vsub.f32 %v968_v31, %v971_v39  ;;  %v2060_v31 = vld [vmem:[%s2464_s18 + $0x18] sm:$0xff] }
 0x2b1   : > { %v973_v41 = vmul.f32 1.442695, %v972_v40  ;;  %v1692_v40 = vld [vmem:[%s2469_s22 + $0x10] sm:$0xff] }
 0x2b3   : > { %2297 = vpow2.f32 %v973_v41  ;;  %v1691_v41 = vld [vmem:[%s2469_s22 + $0x8] sm:$0xff] }
 0x2c0   : > { %v2298_v42 = vpop.eup %2297 }
 0x2c1   : > { %v975_v43 = vsel %vm727_vm3, %v2298_v42, 0.0 }
 0x2c2   : > { %976 = vadd.xlane.f32.xlu1 %v975_v43  ;;  %v1782_v43 = vld [vmem:[%s2483_s14 + $0x38] sm:$0xff] }
 0x2d3   : > { %981 = vrot.lane.b32.xlu1 %v2552_v19, %s2353_s1 }
 0x2d7   : > { %v813_v44 = vpop.xlane.xlu0 %812  ;;  %1207 = vrot.lane.b32.xlu1 %v2537_v15, %s2354_s2 }
 0x2d8   : > { %2299 = vrcp.f32 %v813_v44  ;;  %v1781_v44 = vld [vmem:[%s2483_s14 + $0x30] sm:$0xff] }
 0x2db   : > { %1205 = vrot.lane.b32.xlu1 %v2543_v16, %s2354_s2  ;;  %v1296_v54 = vpop.permute.xlu0 %1295 }
 0x2e5   : > { %v2300_v45 = vpop.eup %2299 }
 0x2e6   : > { %v815_v46 = vmul.f32 %v2300_v45, %v2296_v37  ;;  %v1693_v37 = vld [vmem:[%s2469_s22 + $0x18] sm:$0xff]  ;;  %v1780_v45 = vld [vmem:[%s2483_s14 + $0x28] sm:$0xff] }
 0x2e8   : > { %2168 = vmatmul.mubr.msk.f32.vlgmr.msra.gmra.mxu1 %vm727_vm3, %v815_v46  ;;  %v1779_v46 = vld [vmem:[%s2483_s14 + $0x20] sm:$0xff] }
 0x2e9   : > { %2177 = vmatprep.mubr.msk.f32.mxu1 %vm2352_vm2, %v2351_v3 }
 0x34b   : > { %v977_v48 = vpop.xlane.xlu1 %976 }
 0x34c   : > { %2301 = vrcp.f32 %v977_v48 }
 0x34f   : > { %v982_v49 = vpop.permute.xlu1 %981 }
 0x350   : > { %2176 = vmatpush3.msra.mxu1 %v982_v49 }
 0x351   : > { %2185 = vmatprep.subr.mxu1 %v2351_v3 }
 0x353   : > { %v1208_v56 = vpop.permute.xlu1 %1207 }
 0x357   : > { %v1206_v59 = vpop.permute.xlu1 %1205 }
 0x359   : > { %v2302_v50 = vpop.eup %2301 }
 0x35a   : > { %v979_v51 = vmul.f32 %v2302_v50, %v2298_v42  ;;  %v1690_v42 = vld [vmem:[%s2469_s22] sm:$0xff] }
 0x35c   : > { %2178 = vmatmul.mubr.msk.f32.vlgmr.msra.gmra.mxu1 %vm727_vm3, %v979_v51 }
 0x35d   : > { %2186 = vmatpush3.msra.mxu1 %v889_v52  ;;  %2187 = vmatprep.mubr.msk.f32.mxu1 %vm2352_vm2, %v2351_v3  ;;  %v1777_v52 = vld [vmem:[%s2483_s14 + $0x10] sm:$0xff] }
 0x35e   : > { %2195 = vmatprep.subr.mxu1 %v2351_v3 }
 0x3a8   : > { %v885_v53 = vpop.f32.mrf.mxu1 }
 0x3a9   : > { %2188 = vmatmul.mubr.msk.f32.vlgmr.msra.gmra.mxu1 %vm727_vm3, %v885_v53  ;;  %v1776_v53 = vld [vmem:[%s2483_s14 + $0x8] sm:$0xff] }
 0x3aa   : > { %2196 = vmatpush3.msra.mxu1 %v1296_v54  ;;  %v2169_v55 = vpop.f32.mrf.mxu1  ;;  %2197 = vmatprep.mubr.msk.f32.mxu1 %vm2352_vm2, %v2351_v3  ;;  %v1775_v54 = vld [vmem:[%s2483_s14] sm:$0xff] }
 0x3ab   : > { %2205 = vmatprep.subr.mxu1 %v2351_v3  ;;  %v2062_v55 = vld [vmem:[%s475_s25] ss:$0 sm:$0xff] }
 0x41c   : > { %v1053_v57 = vpop.f32.mrf.mxu1 }
 0x41d   : > { %2183 = vmatmul.mubr.msk.f32.vlgmr.msra.gmra.mxu0 %vm727_vm3, %v1053_v57 }
 0x41e   : > { %2191 = vmatpush3.xpose.msk.msra.mxu0 %vm727_vm3, %v1208_v56  ;;  %v2179_v58 = vpop.f32.mrf.mxu1  ;;  %2192 = vmatprep.mubr.msk.f32.mxu0 %vm2352_vm2, %v2351_v3 }
 0x41f   : > { %2200 = vmatprep.subr.mxu0 %v2351_v3 }
 0x421   : > { %2193 = vmatmul.mubr.msk.f32.vlgmr.msra.gmra.mxu0 %vm727_vm3, %v1206_v59  ;;  %v2064_v59 = vld [vmem:[%s483_s28] ss:$0 sm:$0xff] }
 0x422   : > { %2202 = vmatprep.mubr.msk.f32.mxu0 %vm2352_vm2, %v2351_v3 }
 0x469   : > { %v1201_v60 = vpop.f32.mrf.mxu1 }
 0x46b   : > { %v2189_v61 = vpop.f32.mrf.mxu1 }
 0x4dd   : > { %v1128_v62 = vpop.f32.mrf.mxu0 }
 0x4de   : > { %v1202_v24 = vadd.f32 %v1201_v60, %v1128_v62 }
 0x4df   : > { %v2184_v63 = vpop.f32.mrf.mxu0 }
 0x4e1   : > { %v1279_v0 = vpop.f32.mrf.mxu0 }
 0x4e2   : > { %v1283_v1 = vsel %vm726_vm4, %v1279_v0, -1e+10 }
 0x4e3   : > { %v2194_v2 = vpop.f32.mrf.mxu0  ;;  %v1284_v4 = vsel %vm727_vm3, %v1283_v1, -inf }
 0x4e4   : > { %1285 = vmax.xlane.f32.xlu1 %v1284_v4 }
 0x56d   : > { %v1286_v5 = vpop.xlane.xlu1 %1285 }
 0x56e   : > { %v1287_v6 = vsub.f32 %v1283_v1, %v1286_v5 }
 0x570   : > { %v1288_v7 = vmul.f32 1.442695, %v1287_v6 }
 0x572   : > { %2303 = vpow2.f32 %v1288_v7 }
 0x57f   : > { %v2304_v8 = vpop.eup %2303 }
 0x580   : > { %v1290_v10 = vsel %vm727_vm3, %v2304_v8, 0.0 }
 0x581   : > { %1291 = vadd.xlane.f32.xlu0 %v1290_v10 }
 0x597   : > { %1449 = vrot.lane.b32.xlu0 %v2537_v15, %s2355_s3  ;;  %v2055_v15 = vld [vmem:[%s2464_s18 + $0x10] sm:$0xff] }
 0x598   : > { %2201 = vmatpush3.msra.mxu0 %v2055_v15 }
 0x599   : > { %2210 = vmatprep.subr.mxu0 %v2351_v3 }
 0x59b   : > { %1447 = vrot.lane.b32.xlu0 %v2543_v16, %s2355_s3 }
 0x60a   : > { %v1292_v11 = vpop.xlane.xlu0 %1291 }
 0x60b   : > { %2305 = vrcp.f32 %v1292_v11 }
 0x60e   : > { %v1450_v13 = vpop.permute.xlu0 %1449 }
 0x612   : > { %v1448_v17 = vpop.permute.xlu0 %1447 }
 0x618   : > { %v2306_v12 = vpop.eup %2305 }
 0x619   : > { %v1294_v14 = vmul.f32 %v2306_v12, %v2304_v8 }
 0x61b   : > { %2198 = vmatmul.mubr.msk.f32.vlgmr.msra.gmra.mxu1 %vm727_vm3, %v1294_v14 }
 0x61c   : > { %2206 = vmatpush3.xpose.msk.msra.mxu1 %vm727_vm3, %v1450_v13  ;;  %2207 = vmatprep.mubr.msk.f32.mxu1 %vm2352_vm2, %v2351_v3 }
 0x61d   : > { %2215 = vmatprep.subr.mxu1 %v2351_v3 }
 0x61f   : > { %2208 = vmatmul.mubr.msk.f32.vlgmr.msra.gmra.mxu1 %vm727_vm3, %v1448_v17 }
 0x620   : > { %2217 = vmatprep.mubr.msk.f32.mxu1 %vm2352_vm2, %v2351_v3  ;;  %2216 = vmatpush3.msra.mxu1 %v2060_v31 }
 0x621   : > { %2231 = vmatprep.subr.mxu1 %v2351_v3 }
 0x6db   : > { %v1367_v16 = vpop.f32.mrf.mxu1 }
 0x6dc   : > { %2203 = vmatmul.mubr.msk.f32.vlgmr.msra.gmra.mxu0 %vm727_vm3, %v1367_v16 }
 0x6dd   : > { %v2199_v18 = vpop.f32.mrf.mxu1  ;;  %2212 = vmatprep.mubr.msk.f32.mxu0 %vm2352_vm2, %v2351_v3 }
 0x6df   : > { %v1521_v20 = vpop.f32.mrf.mxu1 }
 0x6e0   : > { %v1525_v21 = vsel %vm726_vm4, %v1521_v20, -1e+10 }
 0x6e1   : > { %v2209_v22 = vpop.f32.mrf.mxu1  ;;  %v1526_v23 = vsel %vm727_vm3, %v1525_v21, -inf }
 0x6e2   : > { %1527 = vmax.xlane.f32.xlu0 %v1526_v23 }
 0x76b   : > { %v1528_v26 = vpop.xlane.xlu0 %1527 }
 0x76c   : > { %v1529_v27 = vsub.f32 %v1525_v21, %v1528_v26 }
 0x76e   : > { %v1530_v28 = vmul.f32 1.442695, %v1529_v27 }
 0x770   : > { %2307 = vpow2.f32 %v1530_v28 }
 0x77d   : > { %v2308_v29 = vpop.eup %2307 }
 0x77e   : > { %v1532_v30 = vsel %vm727_vm3, %v2308_v29, 0.0 }
 0x77f   : > { %1533 = vadd.xlane.f32.xlu1 %v1532_v30 }
 0x790   : > { %1537 = vrot.lane.b32.xlu1 %v2552_v19, %s2355_s3 }
 0x79c   : > { %v1442_v25 = vpop.f32.mrf.mxu0 }
 0x79d   : > { %v1446_v32 = vadd.f32 %v1442_v25, %v1202_v24 }
 0x79e   : > { %v2204_v33 = vpop.f32.mrf.mxu0 }
 0x808   : > { %v1534_v34 = vpop.xlane.xlu1 %1533 }
 0x809   : > { %2309 = vrcp.f32 %v1534_v34 }
 0x80c   : > { %v1538_v35 = vpop.permute.xlu1 %1537 }
 0x80d   : > { %2211 = vmatpush3.msra.mxu0 %v1538_v35 }
 0x80e   : > { %2220 = vmatprep.subr.mxu0 %v2351_v3 }
 0x816   : > { %v2310_v36 = vpop.eup %2309 }
 0x817   : > { %v1536_v19 = vmul.f32 %v2310_v36, %v2308_v29 }
 0x819   : > { %2213 = vmatmul.mubr.msk.f32.vlgmr.msra.gmra.mxu0 %vm727_vm3, %v1536_v19 }
 0x81a   : > { %2228 = vmatprep.mubr.msk.f32.mxu0 %vm2352_vm2, %v2351_v3  ;;  %2221 = vmatpush3.msra.mxu0 %v1693_v37 }
 0x81b   : > { %2222 = vmatprep.subr.mxu0 %v2351_v3 }
 0x81c   : > { %2223 = vmatpush3.msra.mxu0 %v1692_v40 }
 0x81d   : > { %2224 = vmatprep.subr.mxu0 %v2351_v3 }
 0x81e   : > { %2225 = vmatpush3.msra.mxu0 %v1691_v41 }
 0x81f   : > { %2226 = vmatprep.subr.mxu0 %v2351_v3 }
 0x820   : > { %2227 = vmatpush3.msra.mxu0 %v1690_v42 }
 0x8d9   : > { %v1609_v38 = vpop.f32.mrf.mxu0 }
 0x8da   : > { %2218 = vmatmul.mubr.msk.f32.vlgmr.msra.gmra.mxu1 %vm727_vm3, %v1609_v38 }
 0x8db   : > { %v2214_v39 = vpop.f32.mrf.mxu0  ;;  %2247 = vmatprep.mubr.msk.f32.mxu1 %vm2352_vm2, %v2351_v3  ;;  %2232 = vmatpush3.msra.mxu1 %v1782_v43 }
 0x8dc   : > { %2233 = vmatprep.subr.mxu1 %v2351_v3 }
 0x8dd   : > { %2234 = vmatpush3.msra.mxu1 %v1781_v44 }
 0x8de   : > { %2235 = vmatprep.subr.mxu1 %v2351_v3 }
 0x8df   : > { %2236 = vmatpush3.msra.mxu1 %v1780_v45 }
 0x8e0   : > { %2237 = vmatprep.subr.mxu1 %v2351_v3 }
 0x8e1   : > { %2238 = vmatpush3.msra.mxu1 %v1779_v46 }
 0x8e2   : > { %2239 = vmatprep.subr.mxu1 %v2351_v3 }
 0x8e3   : > { %2240 = vmatpush3.msra.mxu1 %v1778_v47 }
 0x8e4   : > { %2241 = vmatprep.subr.mxu1 %v2351_v3 }
 0x8e5   : > { %2242 = vmatpush3.msra.mxu1 %v1777_v52 }
 0x8e6   : > { %2243 = vmatprep.subr.mxu1 %v2351_v3 }
 0x8e7   : > { %2244 = vmatpush3.msra.mxu1 %v1776_v53 }
 0x8e8   : > { %2245 = vmatprep.subr.mxu1 %v2351_v3 }
 0x8e9   : > { %2246 = vmatpush3.msra.mxu1 %v1775_v54 }
 0x99a   : > { %v1684_v48 = vpop.f32.mrf.mxu1 }
 0x99b   : > { %v1688_v49 = vadd.f32 %v1684_v48, %v1446_v32 }
 0x99c   : > { %v2219_v50 = vpop.f32.mrf.mxu1 }
 0x99d   : > { %v1689_v51 = vadd.f32 %v1688_v49, %v2506_v9 }
 0x99f   : > { %2229 = vmatmul.mubr.msk.f32.vlgmr.msra.gmra.mxu0 %vm500_vm1, %v1689_v51 }
 0xa5f   : > { %v1770_v9 = vpop.f32.mrf.mxu0 }
 0xa60   : > { %v1771_v56 = vadd.f32 %v2062_v55, %v1770_v9 }
 0xa61   : > { %v2230_v57 = vpop.f32.mrf.mxu0 }
 0xa62   : > { %v1774_v58 = vmax.f32 %v1771_v56, 0.0 }
 0xa64   : > { %2248 = vmatmul.mubr.msk.f32.vlgmr.msra.gmra.mxu1 %vm1790_vm5, %v1774_v58 }
 0xb24   : > { %v1860_v60 = vpop.f32.mrf.mxu1 }
 0xb25   : > { %v1861_v61 = vadd.f32 %v2064_v59, %v1860_v60 }
 0xb26   : > { %v2249_v3 = vpop.f32.mrf.mxu1 }
 0xb27   : > { %v1864_v62 = vadd.f32 %v1861_v61, %v1689_v51 }
 0xb29   : > { %1865 = vst.msk [vmem:[%s2488_s0] sm:$0xff] %vm500_vm1, %v1864_v62 }
 0xb2a PF: > { %s19_s13 = sadd.s32 1, %s2349_s13   ;;  %s2718_s10 = sld [smem:[#allocation2_spill]] }
 0xb2b   : > { %p16_p8 = scmp.ge.s32.totalorder %s19_s13, 6   ;;  %s2719_s17 = sld [smem:[#allocation3_spill]] }
 0xb2c   : > { %s2720_s12 = sld [smem:[#allocation4_spill]]  ;;  %s2721_s30 = smov %s2341_s11 }
 0xb2d   :  { %18 = sbr.rel (!%p16_p8) target bundleno = 6 (0x6), region = 117 }
 0xb31   : > { %s2722_s11 = smov %s2719_s17 }

</bundles_post_ra>
